<compile_context>
chip_gen: v5e
topology: v5e:2x2
jax: 0.10.0
libtpu: 0.0.40
codegen_flags: <defaults>
</compile_context>

<pallas_src>
import functools

import jax
import jax.numpy as jnp
from jax import lax
from jax.experimental import pallas as pl
from jax.experimental.pallas import tpu as pltpu


def _focal_loss_kernel(logits_ref, targets_ref, out_ref, *,
                       alpha, gamma, n_true, tile_n, c, tiles_per_core):
    core = pl.program_id(0)   # "parallel" axis (megacore split on v7x)
    i = pl.program_id(1)      # "arbitrary" reduction axis over this core's tiles

    # Zero this core's resident per-row accumulator on its first tile.
    @pl.when(i == 0)
    def _():
        out_ref[...] = jnp.zeros_like(out_ref)

    x = logits_ref[...].astype(jnp.float32)     # (tile_n, C), f32 compute
    t = targets_ref[...]                        # (tile_n, 1) int32

    # Logical rows handled by this grid step; masks both the padded tail of the
    # last real tile and any fully out-of-range (clamped) tiles.
    tile_idx = core * tiles_per_core + i
    row_ids = tile_idx * tile_n + lax.broadcasted_iota(jnp.int32, (tile_n, 1), 0)
    row_valid = row_ids < n_true                # (tile_n, 1) bool

    # Numerically-stable log-sum-exp pieces; gather the target entry from the
    # shifted z (reuses the logsumexp intermediate instead of re-sweeping x).
    m = jnp.max(x, axis=-1, keepdims=True)                          # (tile_n, 1)
    z = x - m
    exp_z = jnp.exp(z)
    sum_exp = jnp.sum(exp_z, axis=-1, keepdims=True)                # (tile_n, 1)

    col_ids = lax.broadcasted_iota(jnp.int32, (tile_n, c), 1)       # (tile_n, C)
    onehot = col_ids == t
    # TODO(synk): out-of-range targets (e.g. PyTorch ignore_index=-100) are not
    # excluded; they behave as if the target logit were the row max.
    target_z = jnp.sum(jnp.where(onehot, z, 0.0), axis=-1, keepdims=True)

    # Per-sample cross entropy; clamp >= 0 to kill the pt>1 hazard.
    ce = jnp.maximum(jnp.log(sum_exp) - target_z, 0.0)              # (tile_n, 1)
    pt = jnp.exp(-ce)
    one_minus_pt = 1.0 - pt

    # (1 - pt) ** gamma : integer gamma -> VPU multiplies, else clamped pow.
    if float(gamma) == float(int(gamma)) and 0 <= int(gamma) <= 8:
        w = jnp.ones_like(one_minus_pt)
        for _ in range(int(gamma)):
            w = w * one_minus_pt
    else:
        w = jnp.power(jnp.maximum(one_minus_pt, 0.0), jnp.float32(gamma))

    focal = jnp.float32(alpha) * w * ce
    # Select (not multiply!) so NaN/Inf from padded garbage rows never leaks.
    focal = jnp.where(row_valid, focal, 0.0)

    out_ref[...] += focal                       # per-row partial sums, VPU only


def focal_loss_pallas(logits, targets, alpha=1.0, gamma=2.0,
                      tile_n=None, num_cores=2):
    """logits: (N, C) float (f32 or bf16); targets: (N,) int class indices.

    Returns a scalar f32 focal loss (mean over the batch).
    """
    n, c = logits.shape
    targets2d = targets.astype(jnp.int32).reshape(n, 1)
    dtype_bytes = jnp.dtype(logits.dtype).itemsize

    # Pick TILE_N: ~8 MiB logits block, rows a multiple of 16 (works for both
    # f32 and bf16 sublane packing), capped at 2048 rows and the rounded batch.
    if tile_n is None:
        target_rows = max(16, (8 * 1024 * 1024) // max(1, c * dtype_bytes))
        n_rounded = ((n + 15) // 16) * 16
        tile_n = min(2048, target_rows, n_rounded)
    tile_n = max(16, (int(tile_n) // 16) * 16)

    total_tiles = pl.cdiv(n, tile_n)
    tiles_per_core = pl.cdiv(total_tiles, num_cores)
    grid = (num_cores, tiles_per_core)

    # Explicit scoped-VMEM budget: two double-buffered logits tiles + slack.
    # Raises v5e above its 16 MiB default; stays under v7x's 64 MiB physical.
    tile_bytes = tile_n * c * dtype_bytes
    vmem_limit = int(min(56 * 1024 * 1024,
                         max(32 * 1024 * 1024, 2 * tile_bytes + 4 * 1024 * 1024)))
    # TODO(synk): for very large class counts (C ~ 512K+ f32) a single 16-row
    # block no longer fits v7x VMEM; add an inner "arbitrary" C axis with an
    # online logsumexp / running target-prob accumulator.

    last_tile = total_tiles - 1

    def row_block(ci, ti):
        # Clamp fully out-of-range tiles onto the last real (padded) tile; their
        # rows are zeroed inside the kernel via the row_ids < n mask.
        return jnp.minimum(ci * tiles_per_core + ti, last_tile)

    kernel = functools.partial(
        _focal_loss_kernel,
        alpha=float(alpha), gamma=float(gamma),
        n_true=n, tile_n=tile_n, c=c, tiles_per_core=tiles_per_core,
    )

    cost = pl.CostEstimate(
        flops=7 * n * c,
        transcendentals=n * c,
        bytes_accessed=n * c * dtype_bytes + n * 4 + num_cores * tile_n * 4,
    )

    partial_rows = pl.pallas_call(
        kernel,
        out_shape=jax.ShapeDtypeStruct((num_cores, tile_n, 1), jnp.float32),
        grid=grid,
        in_specs=[
            pl.BlockSpec((tile_n, c), lambda ci, ti: (row_block(ci, ti), 0)),
            pl.BlockSpec((tile_n, 1), lambda ci, ti: (row_block(ci, ti), 0)),
        ],
        # Squeezed leading core dim; block index constant along the "arbitrary"
        # axis -> resident per-core accumulator, written back once per core.
        out_specs=pl.BlockSpec((None, tile_n, 1), lambda ci, ti: (ci, 0, 0)),
        compiler_params=pltpu.CompilerParams(
            dimension_semantics=("parallel", "arbitrary"),
            vmem_limit_bytes=vmem_limit,
        ),
        cost_estimate=cost,
    )(logits, targets2d)

    # Tiny cross-core / cross-row finish in plain JAX: mean over TRUE batch size.
    return jnp.sum(partial_rows) / jnp.float32(n)


def focal_loss_ref(logits, targets, alpha=1.0, gamma=2.0):
    logp = jax.nn.log_softmax(logits.astype(jnp.float32), axis=-1)
    ce = -jnp.take_along_axis(logp, targets[:, None].astype(jnp.int32), axis=-1)[:, 0]
    pt = jnp.exp(-ce)
    return jnp.mean(alpha * (1.0 - pt) ** gamma * ce)


if __name__ == "__main__":
    key = jax.random.PRNGKey(0)
    k1, k2 = jax.random.split(key)

    # Small shapes consistent with the module: batch=8 samples, 16 classes.
    N, C = 8, 16
    logits = jax.random.normal(k1, (N, C), dtype=jnp.float32)
    targets = jax.random.randint(k2, (N,), 0, C, dtype=jnp.int32)

    out = jax.block_until_ready(
        focal_loss_pallas(logits, targets, alpha=1.0, gamma=2.0))
    ref = focal_loss_ref(logits, targets, alpha=1.0, gamma=2.0)
    assert jnp.allclose(out, ref, rtol=1e-5, atol=1e-6), (out, ref)

    # Multi-tile grid (N not a multiple of the tile, both grid axes > 1) to
    # exercise the accumulator, last-partial-tile masking and clamped-tile path.
    N2, C2 = 300, 128
    logits2 = jax.random.normal(k1, (N2, C2), dtype=jnp.float32)
    targets2 = jax.random.randint(k2, (N2,), 0, C2, dtype=jnp.int32)
    out2 = jax.block_until_ready(
        focal_loss_pallas(logits2, targets2, alpha=0.5, gamma=2.0, tile_n=64))
    ref2 = focal_loss_ref(logits2, targets2, alpha=0.5, gamma=2.0)
    assert jnp.allclose(out2, ref2, rtol=1e-5, atol=1e-6), (out2, ref2)

    # bf16 logits path (halves HBM traffic; compute stays f32 inside the kernel).
    logits3 = logits2.astype(jnp.bfloat16)
    out3 = jax.block_until_ready(
        focal_loss_pallas(logits3, targets2, alpha=0.5, gamma=2.0))
    ref3 = focal_loss_ref(logits3.astype(jnp.float32), targets2,
                          alpha=0.5, gamma=2.0)
    assert jnp.allclose(out3, ref3, rtol=2e-2, atol=2e-3), (out3, ref3)

    print("KERNEL_OK")
</pallas_src>

<mosaic_0001>
module attributes {stable_mosaic.version = 11 : i64} {
  func.func @_focal_loss_kernel(%arg0: i32, %arg1: i32, %arg2: memref<16x16xf32, #tpu.memory_space<vmem>>, %arg3: memref<16x1xi32, #tpu.memory_space<vmem>>, %arg4: memref<1x16x1xf32, #tpu.memory_space<vmem>>) attributes {dimension_semantics = [#tpu.dimension_semantics<parallel>, #tpu.dimension_semantics<arbitrary>], iteration_bounds = array<i64: 2, 1>, scalar_prefetch = 0 : i64, scratch_operands = 0 : i64, tpu.core_type = #tpu.core_type<tc>, window_params = [{transform_indices = @transform_0, window_bounds = array<i64: 16, 16>}, {transform_indices = @transform_1, window_bounds = array<i64: 16, 1>}, {transform_indices = @transform_2, window_bounds = array<i64: 1, 16, 1>}]} {
    %c0_i32 = arith.constant 0 : i32
    %0 = arith.cmpi eq, %arg1, %c0_i32 : i32
    %1 = arith.extui %0 : i1 to i32
    %c0_i32_0 = arith.constant 0 : i32
    %2 = arith.cmpi ne, %1, %c0_i32_0 : i32
    scf.if %2 {
      %cst_19 = arith.constant 0.000000e+00 : f32
      %50 = vector.broadcast %cst_19 : f32 to vector<16x1xf32>
      %c0_20 = arith.constant 0 : index
      %c0_21 = arith.constant 0 : index
      %c0_22 = arith.constant 0 : index
      %51 = vector.load %arg4[%c0_20, %c0_21, %c0_22] : memref<1x16x1xf32, #tpu.memory_space<vmem>>, vector<1x16x1xf32>
      %52 = vector.shape_cast %51 : vector<1x16x1xf32> to vector<16x1xf32>
      %53 = vector.shape_cast %50 : vector<16x1xf32> to vector<1x16x1xf32>
      tpu.vector_store %arg4[%c0_20, %c0_21, %c0_22], %53 {strides = array<i32>} : memref<1x16x1xf32, #tpu.memory_space<vmem>>, vector<1x16x1xf32>,
    } else {
    }
    %c0 = arith.constant 0 : index
    %c0_1 = arith.constant 0 : index
    %3 = vector.load %arg2[%c0, %c0_1] : memref<16x16xf32, #tpu.memory_space<vmem>>, vector<16x16xf32>
    %c0_2 = arith.constant 0 : index
    %c0_3 = arith.constant 0 : index
    %4 = vector.load %arg3[%c0_2, %c0_3] : memref<16x1xi32, #tpu.memory_space<vmem>>, vector<16x1xi32>
    %c1_i32 = arith.constant 1 : i32
    %5 = arith.muli %arg0, %c1_i32 : i32
    %6 = arith.addi %5, %arg1 : i32
    %c16_i32 = arith.constant 16 : i32
    %7 = arith.muli %6, %c16_i32 : i32
    %8 = tpu.iota {dimensions = array<i32: 0>} : vector<16x1xi32>
    %9 = vector.broadcast %7 : i32 to vector<16x1xi32>
    %10 = arith.addi %9, %8 : vector<16x1xi32>
    %c8_i32 = arith.constant 8 : i32
    %11 = vector.broadcast %c8_i32 : i32 to vector<16x1xi32>
    %12 = arith.cmpi slt, %10, %11 : vector<16x1xi32>
    %cst = arith.constant dense<0xFF800000> : vector<16xf32>
    %13 = vector.multi_reduction <maximumf>, %3, %cst [1] : vector<16x16xf32> to vector<16xf32>
    %14 = vector.shape_cast %13 : vector<16xf32> to vector<16x1xf32>
    %15 = vector.broadcast %14 : vector<16x1xf32> to vector<16x16xf32>
    %16 = arith.subf %3, %15 : vector<16x16xf32>
    %17 = math.exp %16 : vector<16x16xf32>
    %cst_4 = arith.constant dense<0.000000e+00> : vector<16xf32>
    %18 = vector.multi_reduction <add>, %17, %cst_4 [1] : vector<16x16xf32> to vector<16xf32>
    %19 = vector.shape_cast %18 : vector<16xf32> to vector<16x1xf32>
    %20 = tpu.iota {dimensions = array<i32: 1>} : vector<16x16xi32>
    %21 = vector.broadcast %4 : vector<16x1xi32> to vector<16x16xi32>
    %22 = arith.cmpi eq, %20, %21 : vector<16x16xi32>
    %cst_5 = arith.constant 0.000000e+00 : f32
    %23 = vector.broadcast %cst_5 : f32 to vector<16x16xf32>
    %24 = arith.select %22, %16, %23 : vector<16x16xi1>, vector<16x16xf32>
    %cst_6 = arith.constant dense<0.000000e+00> : vector<16xf32>
    %25 = vector.multi_reduction <add>, %24, %cst_6 [1] : vector<16x16xf32> to vector<16xf32>
    %26 = vector.shape_cast %25 : vector<16xf32> to vector<16x1xf32>
    %27 = math.log %19 : vector<16x1xf32>
    %28 = arith.subf %27, %26 : vector<16x1xf32>
    %cst_7 = arith.constant 0.000000e+00 : f32
    %29 = vector.broadcast %cst_7 : f32 to vector<16x1xf32>
    %30 = arith.maximumf %28, %29 : vector<16x1xf32>
    %cst_8 = arith.constant 0.000000e+00 : f32
    %31 = vector.broadcast %cst_8 : f32 to vector<16x1xf32>
    %32 = arith.subf %31, %30 : vector<16x1xf32>
    %33 = math.exp %32 : vector<16x1xf32>
    %cst_9 = arith.constant 1.000000e+00 : f32
    %34 = vector.broadcast %cst_9 : f32 to vector<16x1xf32>
    %35 = arith.subf %34, %33 : vector<16x1xf32>
    %cst_10 = arith.constant 1.000000e+00 : f32
    %36 = vector.broadcast %cst_10 : f32 to vector<16x1xf32>
    %37 = arith.mulf %36, %35 : vector<16x1xf32>
    %38 = arith.mulf %37, %35 : vector<16x1xf32>
    %cst_11 = arith.constant 1.000000e+00 : f32
    %39 = vector.broadcast %cst_11 : f32 to vector<16x1xf32>
    %40 = arith.mulf %39, %38 : vector<16x1xf32>
    %41 = arith.mulf %40, %30 : vector<16x1xf32>
    %cst_12 = arith.constant 0.000000e+00 : f32
    %42 = vector.broadcast %cst_12 : f32 to vector<16x1xf32>
    %43 = arith.select %12, %41, %42 : vector<16x1xi1>, vector<16x1xf32>
    %c0_13 = arith.constant 0 : index
    %c0_14 = arith.constant 0 : index
    %c0_15 = arith.constant 0 : index
    %44 = vector.load %arg4[%c0_13, %c0_14, %c0_15] : memref<1x16x1xf32, #tpu.memory_space<vmem>>, vector<1x16x1xf32>
    %45 = vector.shape_cast %44 : vector<1x16x1xf32> to vector<16x1xf32>
    %46 = arith.addf %45, %43 : vector<16x1xf32>
    %c0_16 = arith.constant 0 : index
    %c0_17 = arith.constant 0 : index
    %c0_18 = arith.constant 0 : index
    %47 = vector.load %arg4[%c0_16, %c0_17, %c0_18] : memref<1x16x1xf32, #tpu.memory_space<vmem>>, vector<1x16x1xf32>
    %48 = vector.shape_cast %47 : vector<1x16x1xf32> to vector<16x1xf32>
    %49 = vector.shape_cast %46 : vector<16x1xf32> to vector<1x16x1xf32>
    tpu.vector_store %arg4[%c0_16, %c0_17, %c0_18], %49 {strides = array<i32>} : memref<1x16x1xf32, #tpu.memory_space<vmem>>, vector<1x16x1xf32>,
    return
  }
  func.func @transform_0(%arg0: i32, %arg1: i32) -> (i32, i32) {
    %c1_i32 = arith.constant 1 : i32
    %0 = arith.muli %arg0, %c1_i32 : i32
    %1 = arith.addi %0, %arg1 : i32
    %c0_i32 = arith.constant 0 : i32
    %2 = arith.minsi %1, %c0_i32 : i32
    %c0_i32_0 = arith.constant 0 : i32
    %c0_i32_1 = arith.constant 0 : i32
    return %2, %c0_i32_0 : i32, i32
  }
  func.func @transform_1(%arg0: i32, %arg1: i32) -> (i32, i32) {
    %c1_i32 = arith.constant 1 : i32
    %0 = arith.muli %arg0, %c1_i32 : i32
    %1 = arith.addi %0, %arg1 : i32
    %c0_i32 = arith.constant 0 : i32
    %2 = arith.minsi %1, %c0_i32 : i32
    %c0_i32_0 = arith.constant 0 : i32
    %c0_i32_1 = arith.constant 0 : i32
    return %2, %c0_i32_0 : i32, i32
  }
  func.func @transform_2(%arg0: i32, %arg1: i32) -> (i32, i32, i32) {
    %c0_i32 = arith.constant 0 : i32
    %c0_i32_0 = arith.constant 0 : i32
    %c0_i32_1 = arith.constant 0 : i32
    return %arg0, %c0_i32, %c0_i32_0 : i32, i32, i32
  }
}

</mosaic_0001>

<bundles_post_ra>
// kernel: tpu_custom_call.1
= control target key start
LH: loop header
LB: loop body
LE: loop exit
PB: predicated region body
PF: predicated region fallthrough
CT: control target
= control target key end

     0   :  { %s500_s9 = smov 0   ;;  %s502_s10 = smov 0   ;;  %s561_s0 = inlined_call_operand.vmem [shape: f32[8,16], index: 0, kind: input, shape index: {}]   ;;  %s562_s1 = inlined_call_operand.vmem [shape: s32[8,1], index: 1, kind: input, shape index: {}]   ;;  %s563_s2 = inlined_call_operand.vmem [shape: f32[2,16,1], index: 2, kind: output, shape index: {}]  }
   0x1   :  { %s504_s11 = smov 0  }
   0x2 LB: > { %s24_s12 = sadd.s32 1, %s477_s10  ;;  %p408_p0 = scmp.ge.s32.totalorder %s481_s11, 1  ;;  %s481_s11 = sphi %s504_s11, %s12_s11   ;;  %s477_s10 = sphi %s502_s10, %s565_s10   ;;  %s473_s9 = sphi %s500_s9, %s564_s9  }
   0x3   : > { %p26_p1 = scmp.ge.s32.totalorder %s24_s12, 2  ;;  %p168_p2 = scmp.lt.s32.totalorder %s481_s11, 3 }
   0x5   : > { %s567_s12 = smov (%p26_p1, %s24_s12), 0  ;;  %p169_p3 = pnand %p408_p0, %p168_p2 }
   0x6   : > { %p206_p4 = scmp.lt.s32.totalorder (!%p169_p3), %s473_s9, 0  ;;  %p237_p6 = scmp.lt.s32.totalorder (!%p169_p3), %s473_s9, 1 }
   0x7   : > { %172 = sbr.rel (%p169_p3) target bundleno = 308 (0x134), region = 28  ;;  %s415_s27 = sshll.u32 (!%p169_p3), %s473_s9, 4 }
   0xc   : > { %v483_v0 = vmov 0   ;;  %s207_s13 = scalar_select %p206_p4, %s473_s9, 0  ;;  %vm263_vm0 = vcmask 130048   ;;  %v255_v7 = vlaneseq  ;;  %vm246_vm3 = vcmask 7168  }
   0xd   : > { %445 = vset.pattern.permute.xlu1 %v483_v0  ;;  %446 = vset.pattern.permute.xlu0 %v483_v0  ;;  %s238_s22 = scalar_select %p237_p6, %s473_s9, 1  ;;  %v484_v25 = vmov 0.0   ;;  %v258_v41 = vstv %s415_s27 }
   0xe   : > { %s409_s14 = sshll.u32 %s207_s13, 1  ;;  %v283_v8 = vand.u32 127, %v255_v7  ;;  %v256_v39 = vshrl.u32 %v255_v7, 7 }
   0xf   : > { %p211_p5 = scmp.lt.s32.totalorder %s409_s14, 0  ;;  %s418_s23 = sshll.u32 %s238_s22, 4 }
  0x10   : > { %s539_s26 = scalar_lea.vmem %s563_s2, %s418_s23  ;;  %v259_v44 = vadd.s32 %v258_v41, %v256_v39  ;;  %v257_v48 = vadd.s32 8, %v256_v39 }
  0x11   : > { %s569_s14 = smov (!%p211_p5, %s409_s14), 0  ;;  %247 = vst.msk [vmem:[%s539_s26] sm:$0xff] %vm246_vm3, %v484_v25 }
  0x12   : > { %s410_s15 = sshll.u32 %s569_s14, 3  ;;  %248 = vst.msk [vmem:[%s539_s26 + $0x8] sm:$0xff] %vm246_vm3, %v484_v25  ;;  %vm261_vm4 = vcmp.lt.s32.totalorder %v259_v44, 8  ;;  %v260_v54 = vadd.s32 %v258_v41, %v257_v48 }
  0x13   : > { %s214_s18 = scalar_lea.vmem %s561_s0, %s410_s15  ;;  %s230_s21 = scalar_lea.vmem %s562_s1, %s410_s15 }
  0x14   : > { %v249_v1 = vld [vmem:[%s214_s18] sm:$0xff]  ;;  %v250_v4 = vld [vmem:[%s214_s18 + $0x8] sm:$0xff]  ;;  %vm262_vm5 = vcmp.lt.s32.totalorder %v260_v54, 8 }
  0x15   : > { %v251_v2 = vld [vmem:[%s230_s21] sm:$0xff]  ;;  %v264_v3 = vsel %vm263_vm0, %v249_v1, -inf  ;;  %v252_v5 = vld [vmem:[%s230_s21 + $0x8] sm:$0xff]  ;;  %v267_v6 = vsel %vm263_vm0, %v250_v4, -inf }
  0x16   : > { %285 = vperm.xlu1 %445, %v251_v2   ;;  %265 = vmax.xlane.f32.xlu0 %v264_v3 }
  0x18   : > { %v322_v49 = vld [vmem:[%s539_s26] sm:$0xff] }
  0x19   : > { %v323_v57 = vld [vmem:[%s539_s26 + $0x8] sm:$0xff] }
  0x1e   : > { %288 = vperm.xlu1 %445, %v252_v5   ;;  %268 = vmax.xlane.f32.xlu0 %v267_v6 }
  0x88   : > { %v286_v9 = vpop.permute.xlu1 %285 }
  0x89   : > { %v266_v10 = vpop.xlane.xlu0 %265  ;;  %vm290_vm1 = vcmp.eq.s32.totalorder %v283_v8, %v286_v9 }
  0x8a   : > { %v270_v11 = vsub.f32 %v249_v1, %v266_v10 }
  0x8c   : > { %v272_v12 = vmul.f32 1.442695, %v270_v11  ;;  %v292_v13 = vsel %vm290_vm1, %v270_v11, 0.0 }
  0x8d   : > { %v294_v14 = vsel %vm263_vm0, %v292_v13, 0.0 }
  0x8e   : > { %447 = vpow2.f32 %v272_v12  ;;  %295 = vadd.xlane.f32.xlu0 %v294_v14 }
  0x90   : > { %v289_v15 = vpop.permute.xlu1 %288 }
  0x91   : > { %v269_v16 = vpop.xlane.xlu0 %268  ;;  %vm291_vm2 = vcmp.eq.s32.totalorder %v283_v8, %v289_v15 }
  0x92   : > { %v271_v17 = vsub.f32 %v250_v4, %v269_v16 }
  0x94   : > { %v448_v18 = vpop.eup %447  ;;  %v274_v19 = vmul.f32 1.442695, %v271_v17  ;;  %v293_v20 = vsel %vm291_vm2, %v271_v17, 0.0 }
  0x95   : > { %v276_v21 = vsel %vm263_vm0, %v448_v18, 0.0  ;;  %v297_v22 = vsel %vm263_vm0, %v293_v20, 0.0 }
  0x96   : > { %449 = vpow2.f32 %v274_v19  ;;  %277 = vadd.xlane.f32.xlu2 %v276_v21  ;;  %298 = vadd.xlane.f32.xlu1 %v297_v22 }
  0x9c   : > { %v450_v23 = vpop.eup %449 }
  0x9d   : > { %v279_v24 = vsel %vm263_vm0, %v450_v23, 0.0 }
  0x9e   : > { %280 = vadd.xlane.f32.xlu2 %v279_v24 }
 0x101   : > { %v296_v30 = vpop.xlane.xlu0 %295 }
 0x109   : > { %v278_v26 = vpop.xlane.xlu2 %277  ;;  %v299_v37 = vpop.xlane.xlu1 %298 }
 0x10a   : > { %451 = vlog2.f32 %v278_v26 }
 0x110   : > { %v452_v27 = vpop.eup %451 }
 0x111   : > { %v301_v28 = vmul.f32 0.6931472, %v452_v27  ;;  %v281_v29 = vpop.xlane.xlu2 %280 }
 0x112   : > { %453 = vlog2.f32 %v281_v29 }
 0x113   : > { %v304_v31 = vsub.f32 %v301_v28, %v296_v30 }
 0x115   : > { %v306_v32 = vmax.f32 %v304_v31, 0.0 }
 0x117   : > { %v308_v33 = vsub.f32 0.0, %v306_v32 }
 0x118   : > { %v454_v34 = vpop.eup %453 }
 0x119   : > { %v310_v35 = vmul.f32 1.442695, %v308_v33  ;;  %v303_v36 = vmul.f32 0.6931472, %v454_v34 }
 0x11b   : > { %455 = vpow2.f32 %v310_v35  ;;  %v305_v38 = vsub.f32 %v303_v36, %v299_v37 }
 0x11d   : > { %v307_v40 = vmax.f32 %v305_v38, 0.0 }
 0x11f   : > { %v309_v42 = vsub.f32 0.0, %v307_v40 }
 0x121   : > { %v456_v43 = vpop.eup %455  ;;  %v312_v45 = vmul.f32 1.442695, %v309_v42 }
 0x122   : > { %v314_v46 = vsub.f32 1.0, %v456_v43 }
 0x123   : > { %457 = vpow2.f32 %v312_v45 }
 0x124   : > { %v316_v47 = vmul.f32 %v314_v46, %v314_v46 }
 0x126   : > { %v318_v50 = vmul.f32 %v316_v47, %v306_v32 }
 0x128   : > { %v320_v51 = vsel %vm261_vm4, %v318_v50, 0.0 }
 0x129   : > { %v458_v52 = vpop.eup %457  ;;  %v324_v53 = vadd.f32 %v322_v49, %v320_v51 }
 0x12a   : > { %v315_v55 = vsub.f32 1.0, %v458_v52 }
 0x12b   : > { %327 = vst.msk [vmem:[%s539_s26] sm:$0xff] %vm246_vm3, %v324_v53 }
 0x12c   : > { %v317_v56 = vmul.f32 %v315_v55, %v315_v55 }
 0x12e   : > { %v319_v58 = vmul.f32 %v317_v56, %v307_v40 }
 0x130   : > { %v321_v59 = vsel %vm262_vm5, %v319_v58, 0.0 }
 0x131   : > { %v325_v60 = vadd.f32 %v323_v57, %v321_v59 }
 0x133   : > { %328 = vst.msk [vmem:[%s539_s26 + $0x8] sm:$0xff] %vm246_vm3, %v325_v60 }
 0x134 PF: > { %s12_s11 = sadd.s32 1, %s481_s11   ;;  %s564_s9 = smov %s477_s10 }
 0x135   : > { %p9_p7 = scmp.ge.s32.totalorder %s12_s11, 4   ;;  %s565_s10 = smov %s567_s12 }
 0x137   :  { %11 = sbr.rel (!%p9_p7) target bundleno = 2 (0x2), region = 65 }

</bundles_post_ra>
